<compile_context>
chip_gen: v7x
topology: tpu7x:2x2x1
jax: 0.10.0
libtpu: 0.0.40
codegen_flags: <defaults>
</compile_context>

<pallas_src>
import math
from functools import partial

import jax
import jax.numpy as jnp
from jax.experimental import pallas as pl
from jax.experimental.pallas import tpu as pltpu


def _round_up(x: int, m: int) -> int:
    return ((x + m - 1) // m) * m


# ----------------------- fused conv kernel (stride == 1) --------------------

def _fused_conv_kernel(x_ref, w_ref, o_ref, patch_ref, *, KH, KW, C,
                       dilation, Wp, Lp):
    """One batch element per grid step.

    x_ref:     (1, C, Lf)        bf16, flattened zero-padded image (+ tail pad)
    w_ref:     (O, C*KH*KW)      bf16, tap-major flattened weights
    o_ref:     (1, O, Lp)        f32, row-pitch-Wp output (lane-dense, 128-pad)
    patch_ref: (C*KH*KW, Lp)     bf16 VMEM scratch, im2col patch matrix
    """
    # Build the im2col patch matrix from contiguous lane-shifted slices of the
    # flattened padded image (all offsets static -> cheap XLU rolls).
    for kh in range(KH):
        for kw in range(KW):
            t = kh * KW + kw
            off = (kh * Wp + kw) * dilation
            patch_ref[pl.ds(t * C, C), :] = x_ref[0, :, pl.ds(off, Lp)]
    # Single MXU GEMM per image: (O, CKK) x (CKK, Lp) -> (O, Lp), f32 acc.
    o_ref[0] = jnp.dot(w_ref[...], patch_ref[...],
                       preferred_element_type=jnp.float32)


def _fused_conv2d(x, weight, padding, dilation, out_h, out_w):
    B, C, H, W = x.shape
    O, _, KH, KW = weight.shape
    Hp, Wp = H + 2 * padding, W + 2 * padding
    CKK = C * KH * KW

    Lp = out_h * Wp                       # output length with row pitch Wp
    Lp_pad = _round_up(Lp, 128)           # lane-dense (unmasked) stores
    max_off = ((KH - 1) * Wp + (KW - 1)) * dilation
    Lf = Lp_pad + max_off                 # flat input length the kernel reads

    # Host-side prep is all O(input-size): pad spatially, flatten spatial
    # dims (free row-major reshape), then pad/trim the tail so the flat image
    # is exactly Lf long and every shifted slice [off, off + Lp_pad) is in
    # bounds.  The bf16 cast fuses into the same pad pass under XLA.
    xp = jnp.pad(x, ((0, 0), (0, 0), (padding, padding), (padding, padding)))
    xf = xp.reshape(B, C, Hp * Wp)
    if Lf > Hp * Wp:
        xf = jnp.pad(xf, ((0, 0), (0, 0), (0, Lf - Hp * Wp)))
    elif Lf < Hp * Wp:
        xf = xf[:, :, :Lf]
    xf = xf.astype(jnp.bfloat16)

    # OIHW -> (O, KH, KW, C) -> (O, CKK): column t*C + c (t = kh*KW + kw)
    # matches patch_ref row t*C + c built in the kernel.
    wk = jnp.transpose(weight, (0, 2, 3, 1)).reshape(O, CKK)
    wk = wk.astype(jnp.bfloat16)

    kernel = partial(_fused_conv_kernel, KH=KH, KW=KW, C=C,
                     dilation=dilation, Wp=Wp, Lp=Lp_pad)

    flops = 2 * B * O * CKK * Lp_pad
    bytes_accessed = int(xf.size * 2 + wk.size * 2 + B * O * Lp_pad * 4)
    cost = pl.CostEstimate(flops=flops, transcendentals=0,
                           bytes_accessed=bytes_accessed)

    # VMEM budget: double-buffered image block + weights + output + scratch.
    needed = (2 * C * Lf * 2
              + 2 * O * CKK * 2
              + 2 * O * Lp_pad * 4
              + CKK * Lp_pad * 2)
    vmem_limit = None
    if needed > (12 << 20):               # only raise above the small default
        vmem_limit = min(2 * needed, 96 << 20)

    out_flat = pl.pallas_call(
        kernel,
        out_shape=jax.ShapeDtypeStruct((B, O, Lp_pad), jnp.float32),
        grid_spec=pltpu.PrefetchScalarGridSpec(
            num_scalar_prefetch=0,
            grid=(B,),
            in_specs=[
                pl.BlockSpec((1, C, Lf), lambda b: (b, 0, 0)),   # image
                pl.BlockSpec((O, CKK), lambda b: (0, 0)),        # weights
            ],
            out_specs=pl.BlockSpec((1, O, Lp_pad), lambda b: (b, 0, 0)),
            scratch_shapes=[pltpu.VMEM((CKK, Lp_pad), jnp.bfloat16)],
        ),
        compiler_params=pltpu.CompilerParams(
            dimension_semantics=("parallel",),
            vmem_limit_bytes=vmem_limit),
        cost_estimate=cost,
    )(xf, wk)

    # (B, O, out_h*Wp) -> (B, O, out_h, Wp) -> crop the row padding.
    out = out_flat[:, :, :Lp].reshape(B, O, out_h, Wp)[:, :, :, :out_w]
    return out


# ------------------- stride > 1 fallback: unfold + GEMM ---------------------

def _im2col_matmul_kernel(w_ref, p_ref, o_ref):
    # w_ref: (O, CKK), p_ref: (1, CKK, L_pad), o_ref: (1, O, L_pad)
    o_ref[0] = jnp.dot(w_ref[...], p_ref[0],
                       preferred_element_type=jnp.float32)


def _im2col_conv2d(x, weight, stride, padding, dilation, out_h, out_w):
    # TODO(synk): stride > 1 uses a host-side unfold (torch F.unfold layout)
    # feeding a lane-dense per-batch GEMM; only stride == 1 gets the fully
    # fused im2col-free kernel.
    B, C, H, W = x.shape
    O, _, KH, KW = weight.shape
    xp = jnp.pad(x, ((0, 0), (0, 0), (padding, padding), (padding, padding)))
    cols = []
    for kh in range(KH):
        for kw in range(KW):
            h0, w0 = kh * dilation, kw * dilation
            cols.append(xp[:, :,
                           h0:h0 + stride * (out_h - 1) + 1:stride,
                           w0:w0 + stride * (out_w - 1) + 1:stride])
    L = out_h * out_w
    L_pad = _round_up(L, 128)             # lane-dense output stores
    patches = jnp.stack(cols, axis=2).reshape(B, C * KH * KW, L)
    if L_pad > L:
        patches = jnp.pad(patches, ((0, 0), (0, 0), (0, L_pad - L)))
    patches = patches.astype(jnp.bfloat16)
    w_mat = weight.reshape(O, C * KH * KW).astype(jnp.bfloat16)

    out = pl.pallas_call(
        _im2col_matmul_kernel,
        out_shape=jax.ShapeDtypeStruct((B, O, L_pad), jnp.float32),
        grid_spec=pltpu.PrefetchScalarGridSpec(
            num_scalar_prefetch=0,
            grid=(B,),
            in_specs=[
                pl.BlockSpec((O, C * KH * KW), lambda b: (0, 0)),
                pl.BlockSpec((1, C * KH * KW, L_pad), lambda b: (b, 0, 0)),
            ],
            out_specs=pl.BlockSpec((1, O, L_pad), lambda b: (b, 0, 0)),
        ),
        compiler_params=pltpu.CompilerParams(
            dimension_semantics=("parallel",)),
    )(w_mat, patches)
    return out[:, :, :L].reshape(B, O, out_h, out_w)


# ------------------------------ RobustConv2d --------------------------------

def init_robust_conv2d_params(key, in_channels, out_channels, kernel_size,
                              groups=1, bias=True):
    """Deterministic kaiming_uniform(a=sqrt(5)) init, matching the module."""
    kw, kb = jax.random.split(key)
    w_shape = (out_channels, in_channels // groups, kernel_size, kernel_size)
    fan_in = (in_channels // groups) * kernel_size * kernel_size
    bound_w = 1.0 / math.sqrt(fan_in)  # gain*sqrt(3/fan_in) with a=sqrt(5)
    weight = jax.random.uniform(kw, w_shape, jnp.float32, -bound_w, bound_w)
    if bias:
        b = jax.random.uniform(kb, (out_channels,), jnp.float32,
                               -bound_w, bound_w)
    else:
        b = None
    return weight, b


@partial(jax.jit, static_argnames=("stride", "padding", "dilation"))
def robust_conv2d_forward(x, weight, stride=1, padding=0, dilation=1):
    """Forward pass of RobustConv2d (the reference forward never adds bias).

    x:      (B, C, H, W)   float32, NCHW
    weight: (O, C, KH, KW) float32, OIHW   (groups == 1, as the reference
                                            forward itself requires)
    returns (B, O, out_H, out_W) float32
    """
    B, C, H, W = x.shape
    O, Cw, KH, KW = weight.shape
    assert Cw == C, "groups != 1 is not supported (nor by the reference forward)"

    out_h = (H + 2 * padding - dilation * (KH - 1) - 1) // stride + 1
    out_w = (W + 2 * padding - dilation * (KW - 1) - 1) // stride + 1

    if stride == 1:
        return _fused_conv2d(x, weight, padding, dilation, out_h, out_w)
    return _im2col_conv2d(x, weight, stride, padding, dilation, out_h, out_w)


# ---------------------------------- main -------------------------------------

if __name__ == "__main__":
    key = jax.random.PRNGKey(0)
    k_x, k_p = jax.random.split(key)

    batch, in_ch, out_ch, hw, ksize = 2, 4, 8, 16, 3
    stride, padding, dilation = 1, 1, 1

    x = jax.random.normal(k_x, (batch, in_ch, hw, hw), dtype=jnp.float32)
    weight, bias = init_robust_conv2d_params(k_p, in_ch, out_ch, ksize)
    # NOTE: `bias` mirrors the module's parameters but the reference forward
    # never applies it, so it is deliberately unused here.

    out = robust_conv2d_forward(x, weight, stride=stride, padding=padding,
                                dilation=dilation)
    out = jax.block_until_ready(out)

    # Sanity check against XLA's native convolution (f32, highest precision).
    ref = jax.lax.conv_general_dilated(
        x, weight, window_strides=(stride, stride),
        padding=[(padding, padding), (padding, padding)],
        rhs_dilation=(dilation, dilation),
        dimension_numbers=("NCHW", "OIHW", "NCHW"),
        precision=jax.lax.Precision.HIGHEST)
    assert out.shape == ref.shape == (batch, out_ch, hw, hw)
    # bf16 MXU operands with f32 accumulation -> loosened tolerance.
    max_err = float(jnp.max(jnp.abs(out - ref)))
    assert jnp.allclose(out, ref, atol=5e-2, rtol=5e-2), max_err

    print("KERNEL_OK")
</pallas_src>

<mosaic_0001>
module attributes {stable_mosaic.version = 11 : i64} {
  func.func @_fused_conv_kernel(%arg0: i32, %arg1: memref<1x4x422xbf16, #tpu.memory_space<vmem>>, %arg2: memref<8x36xbf16, #tpu.memory_space<vmem>>, %arg3: memref<1x8x384xf32, #tpu.memory_space<vmem>>, %arg4: memref<36x384xbf16, #tpu.memory_space<vmem>>) attributes {dimension_semantics = [#tpu.dimension_semantics<parallel>], iteration_bounds = array<i64: 2>, scalar_prefetch = 0 : i64, scratch_operands = 1 : i64, tpu.core_type = #tpu.core_type<tc>, window_params = [{transform_indices = @transform_0, window_bounds = array<i64: 1, 4, 422>}, {pipeline_mode = #tpu.pipeline_mode<synchronous>, transform_indices = @transform_1, window_bounds = array<i64: 8, 36>}, {transform_indices = @transform_2, window_bounds = array<i64: 1, 8, 384>}]} {
    %c0 = arith.constant 0 : index
    %c0_0 = arith.constant 0 : index
    %c0_1 = arith.constant 0 : index
    %0 = vector.load %arg1[%c0, %c0_0, %c0_1] : memref<1x4x422xbf16, #tpu.memory_space<vmem>>, vector<1x4x384xbf16>
    %1 = vector.shape_cast %0 : vector<1x4x384xbf16> to vector<4x384xbf16>
    %c0_2 = arith.constant 0 : index
    %c0_3 = arith.constant 0 : index
    %2 = vector.load %arg4[%c0_2, %c0_3] : memref<36x384xbf16, #tpu.memory_space<vmem>>, vector<4x384xbf16>
    tpu.vector_store %arg4[%c0_2, %c0_3], %1 {strides = array<i32>} : memref<36x384xbf16, #tpu.memory_space<vmem>>, vector<4x384xbf16>,
    %c0_4 = arith.constant 0 : index
    %c0_5 = arith.constant 0 : index
    %c1 = arith.constant 1 : index
    %3 = vector.load %arg1[%c0_4, %c0_5, %c1] : memref<1x4x422xbf16, #tpu.memory_space<vmem>>, vector<1x4x384xbf16>
    %4 = vector.shape_cast %3 : vector<1x4x384xbf16> to vector<4x384xbf16>
    %c4 = arith.constant 4 : index
    %c0_6 = arith.constant 0 : index
    %5 = vector.load %arg4[%c4, %c0_6] : memref<36x384xbf16, #tpu.memory_space<vmem>>, vector<4x384xbf16>
    tpu.vector_store %arg4[%c4, %c0_6], %4 {strides = array<i32>} : memref<36x384xbf16, #tpu.memory_space<vmem>>, vector<4x384xbf16>,
    %c0_7 = arith.constant 0 : index
    %c0_8 = arith.constant 0 : index
    %c2 = arith.constant 2 : index
    %6 = vector.load %arg1[%c0_7, %c0_8, %c2] : memref<1x4x422xbf16, #tpu.memory_space<vmem>>, vector<1x4x384xbf16>
    %7 = vector.shape_cast %6 : vector<1x4x384xbf16> to vector<4x384xbf16>
    %c8 = arith.constant 8 : index
    %c0_9 = arith.constant 0 : index
    %8 = vector.load %arg4[%c8, %c0_9] : memref<36x384xbf16, #tpu.memory_space<vmem>>, vector<4x384xbf16>
    tpu.vector_store %arg4[%c8, %c0_9], %7 {strides = array<i32>} : memref<36x384xbf16, #tpu.memory_space<vmem>>, vector<4x384xbf16>,
    %c0_10 = arith.constant 0 : index
    %c0_11 = arith.constant 0 : index
    %c18 = arith.constant 18 : index
    %9 = vector.load %arg1[%c0_10, %c0_11, %c18] : memref<1x4x422xbf16, #tpu.memory_space<vmem>>, vector<1x4x384xbf16>
    %10 = vector.shape_cast %9 : vector<1x4x384xbf16> to vector<4x384xbf16>
    %c12 = arith.constant 12 : index
    %c0_12 = arith.constant 0 : index
    %11 = vector.load %arg4[%c12, %c0_12] : memref<36x384xbf16, #tpu.memory_space<vmem>>, vector<4x384xbf16>
    tpu.vector_store %arg4[%c12, %c0_12], %10 {strides = array<i32>} : memref<36x384xbf16, #tpu.memory_space<vmem>>, vector<4x384xbf16>,
    %c0_13 = arith.constant 0 : index
    %c0_14 = arith.constant 0 : index
    %c19 = arith.constant 19 : index
    %12 = vector.load %arg1[%c0_13, %c0_14, %c19] : memref<1x4x422xbf16, #tpu.memory_space<vmem>>, vector<1x4x384xbf16>
    %13 = vector.shape_cast %12 : vector<1x4x384xbf16> to vector<4x384xbf16>
    %c16 = arith.constant 16 : index
    %c0_15 = arith.constant 0 : index
    %14 = vector.load %arg4[%c16, %c0_15] : memref<36x384xbf16, #tpu.memory_space<vmem>>, vector<4x384xbf16>
    tpu.vector_store %arg4[%c16, %c0_15], %13 {strides = array<i32>} : memref<36x384xbf16, #tpu.memory_space<vmem>>, vector<4x384xbf16>,
    %c0_16 = arith.constant 0 : index
    %c0_17 = arith.constant 0 : index
    %c20 = arith.constant 20 : index
    %15 = vector.load %arg1[%c0_16, %c0_17, %c20] : memref<1x4x422xbf16, #tpu.memory_space<vmem>>, vector<1x4x384xbf16>
    %16 = vector.shape_cast %15 : vector<1x4x384xbf16> to vector<4x384xbf16>
    %c20_18 = arith.constant 20 : index
    %c0_19 = arith.constant 0 : index
    %17 = vector.load %arg4[%c20_18, %c0_19] : memref<36x384xbf16, #tpu.memory_space<vmem>>, vector<4x384xbf16>
    tpu.vector_store %arg4[%c20_18, %c0_19], %16 {strides = array<i32>} : memref<36x384xbf16, #tpu.memory_space<vmem>>, vector<4x384xbf16>,
    %c0_20 = arith.constant 0 : index
    %c0_21 = arith.constant 0 : index
    %c36 = arith.constant 36 : index
    %18 = vector.load %arg1[%c0_20, %c0_21, %c36] : memref<1x4x422xbf16, #tpu.memory_space<vmem>>, vector<1x4x384xbf16>
    %19 = vector.shape_cast %18 : vector<1x4x384xbf16> to vector<4x384xbf16>
    %c24 = arith.constant 24 : index
    %c0_22 = arith.constant 0 : index
    %20 = vector.load %arg4[%c24, %c0_22] : memref<36x384xbf16, #tpu.memory_space<vmem>>, vector<4x384xbf16>
    tpu.vector_store %arg4[%c24, %c0_22], %19 {strides = array<i32>} : memref<36x384xbf16, #tpu.memory_space<vmem>>, vector<4x384xbf16>,
    %c0_23 = arith.constant 0 : index
    %c0_24 = arith.constant 0 : index
    %c37 = arith.constant 37 : index
    %21 = vector.load %arg1[%c0_23, %c0_24, %c37] : memref<1x4x422xbf16, #tpu.memory_space<vmem>>, vector<1x4x384xbf16>
    %22 = vector.shape_cast %21 : vector<1x4x384xbf16> to vector<4x384xbf16>
    %c28 = arith.constant 28 : index
    %c0_25 = arith.constant 0 : index
    %23 = vector.load %arg4[%c28, %c0_25] : memref<36x384xbf16, #tpu.memory_space<vmem>>, vector<4x384xbf16>
    tpu.vector_store %arg4[%c28, %c0_25], %22 {strides = array<i32>} : memref<36x384xbf16, #tpu.memory_space<vmem>>, vector<4x384xbf16>,
    %c0_26 = arith.constant 0 : index
    %c0_27 = arith.constant 0 : index
    %c38 = arith.constant 38 : index
    %24 = vector.load %arg1[%c0_26, %c0_27, %c38] : memref<1x4x422xbf16, #tpu.memory_space<vmem>>, vector<1x4x384xbf16>
    %25 = vector.shape_cast %24 : vector<1x4x384xbf16> to vector<4x384xbf16>
    %c32 = arith.constant 32 : index
    %c0_28 = arith.constant 0 : index
    %26 = vector.load %arg4[%c32, %c0_28] : memref<36x384xbf16, #tpu.memory_space<vmem>>, vector<4x384xbf16>
    tpu.vector_store %arg4[%c32, %c0_28], %25 {strides = array<i32>} : memref<36x384xbf16, #tpu.memory_space<vmem>>, vector<4x384xbf16>,
    %c0_29 = arith.constant 0 : index
    %c0_30 = arith.constant 0 : index
    %27 = vector.load %arg2[%c0_29, %c0_30] : memref<8x36xbf16, #tpu.memory_space<vmem>>, vector<8x36xbf16>
    %c0_31 = arith.constant 0 : index
    %c0_32 = arith.constant 0 : index
    %28 = vector.load %arg4[%c0_31, %c0_32] : memref<36x384xbf16, #tpu.memory_space<vmem>>, vector<36x384xbf16>
    %cst = arith.constant dense<0.000000e+00> : vector<8x384xf32>
    %29 = tpu.matmul %27, %28, %cst {dimension_numbers = #tpu.dot_dimension_numbers<[1], [0], [0], [1], [0, 0, 1, 1], [], []>} : vector<8x36xbf16>, vector<36x384xbf16>, vector<8x384xf32> -> vector<8x384xf32>
    %c0_33 = arith.constant 0 : index
    %c0_34 = arith.constant 0 : index
    %c0_35 = arith.constant 0 : index
    %30 = vector.load %arg3[%c0_33, %c0_34, %c0_35] : memref<1x8x384xf32, #tpu.memory_space<vmem>>, vector<1x8x384xf32>
    %31 = vector.shape_cast %30 : vector<1x8x384xf32> to vector<8x384xf32>
    %32 = vector.shape_cast %29 : vector<8x384xf32> to vector<1x8x384xf32>
    tpu.vector_store %arg3[%c0_33, %c0_34, %c0_35], %32 {strides = array<i32>} : memref<1x8x384xf32, #tpu.memory_space<vmem>>, vector<1x8x384xf32>,
    return
  }
  func.func @transform_0(%arg0: i32) -> (i32, i32, i32) {
    %c0_i32 = arith.constant 0 : i32
    %c0_i32_0 = arith.constant 0 : i32
    %c0_i32_1 = arith.constant 0 : i32
    return %arg0, %c0_i32, %c0_i32_0 : i32, i32, i32
  }
  func.func @transform_1(%arg0: i32) -> (i32, i32) {
    %c0_i32 = arith.constant 0 : i32
    %c0_i32_0 = arith.constant 0 : i32
    %c0_i32_1 = arith.constant 0 : i32
    return %c0_i32, %c0_i32_0 : i32, i32
  }
  func.func @transform_2(%arg0: i32) -> (i32, i32, i32) {
    %c0_i32 = arith.constant 0 : i32
    %c0_i32_0 = arith.constant 0 : i32
    %c0_i32_1 = arith.constant 0 : i32
    return %arg0, %c0_i32, %c0_i32_0 : i32, i32, i32
  }
}

</mosaic_0001>

<bundles_post_ra>
// kernel: robust_conv2d_forward.1
= control target key start
LH: loop header
LB: loop body
LE: loop exit
PB: predicated region body
PF: predicated region fallthrough
CT: control target
= control target key end

     0   :  { %s728_s9 = smov 0   ;;  %s766_s0 = inlined_call_operand.vmem [shape: bf16[2,4,422], index: 0, kind: input, shape index: {}]   ;;  %s767_s1 = inlined_call_operand.vmem [shape: bf16[8,36], index: 1, kind: input, shape index: {}]   ;;  %s768_s2 = inlined_call_operand.vmem [shape: f32[2,8,384], index: 2, kind: output, shape index: {}]  }
   0x1 LB: > { %s619_s10 = sadd.s32 4294967295, %s699_s9   ;;  %p623_p0 = scmp.ge.s32.totalorder %s699_s9, 1  ;;  %s699_s9 = sphi %s728_s9, %s12_s9  }
   0x2   : > { %p112_p1 = scmp.lt.s32.totalorder %s699_s9, 3 }
   0x4   : > { %p113_p2 = pnand %p623_p0, %p112_p1 }
   0x5   : > { %p134_p3 = scmp.lt.s32.totalorder (!%p113_p2), %s619_s10, 1  ;;  %v172_v0 = vlaneseq (!%p113_p2)  ;;  %v701_v1 = vmov (!%p113_p2), 1983009808   ;;  %s702_s15 = smov (!%p113_p2), 126   ;;  %v705_v14 = vmov (!%p113_p2), 0.0   ;;  %vm711_vm0 = vmmov (!%p113_p2), 0  }
   0x6   : > { %116 = sbr.rel (%p113_p2) target bundleno = 395 (0x18b), region = 28  ;;  %v170_v2 = vunpack.c.l.s4 (!%p113_p2), %v701_v1  ;;  %s703_s16 = smov (!%p113_p2), 127   ;;  %648 = vmatprep.subr.bf16.mxu1 (!%p113_p2), %v705_v14  ;;  %654 = vmatprep.mubr.msk.bf16.mxu1 (!%p113_p2), %vm711_vm0, %v705_v14  ;;  %v712_v15 = vmov (!%p113_p2), 0   ;;  %vm191_vm1 = vcmask (!%p113_p2), 1039360   ;;  %vm253_vm2 = vcmask (!%p113_p2), 900096  }
   0x7   : > { %v173_v3 = vshrl.u32 (!%p113_p2), %v172_v0, 7  ;;  %s704_s17 = smov (!%p113_p2), 110   ;;  %s706_s18 = smov (!%p113_p2), 109   ;;  %512 = vmatprep.mubr.bf16.mxu0 (!%p113_p2), %v712_v15  ;;  %vm189_vm3 = vcmask (!%p113_p2), 1043456   ;;  %vm222_vm4 = vcmask (!%p113_p2), 1031168   ;;  %vm284_vm5 = vcmask (!%p113_p2), 891904  }
   0x8   : > { %v171_v4 = vunpack.c.0.s8 (!%p113_p2), %v170_v2  ;;  %s707_s19 = smov (!%p113_p2), 108   ;;  %s708_s20 = smov (!%p113_p2), 92   ;;  %vm315_vm6 = vcmask (!%p113_p2), 883712   ;;  %vm346_vm7 = vcmask (!%p113_p2), 752640   ;;  %vm377_vm8 = vcmask (!%p113_p2), 744448  }
   0x9   : > { %s709_s21 = smov (!%p113_p2), 91   ;;  %s710_s22 = smov (!%p113_p2), 90   ;;  %vm408_vm9 = vcmask (!%p113_p2), 736256   ;;  %vm470_vm10 = vcmask (!%p113_p2), 1041408   ;;  %vm466_vm11 = vcmask (!%p113_p2), 293888  }
   0xa   : > { %v174_v5 = vsub.s32 (!%p113_p2), %v171_v4, %v173_v3 }
   0xd   : > { %s770_s10 = smov (!%p134_p3, %s619_s10), 1 }
   0xe   : > { %s643_s11 = sshll.u32 %s770_s10, 3  ;;  %s658_s25 = smul.u32 24, %s770_s10 }
   0xf   : > { %s138_s14 = scalar_lea.vmem %s766_s0, %s643_s11 }
  0x10   : > { %v198_v6 = vld [vmem:[%s138_s14] sm:$0xff]  ;;  %s143_s28 = scalar_lea.vmem %s768_s2, %s658_s25 }
  0x11   : > { %v145_v7 = vld [vmem:[%s138_s14] sm:$0x3f]  ;;  %v207_v8 = vrot.slane %v198_v6, %v174_v5  ;;  %v168_v9 = vcombine.low %v198_v6, %v198_v6  ;;  %v200_v11 = vcombine.high %v198_v6, %v198_v6 }
  0x12   : > { %v147_v10 = vcombine.high %v145_v7, %v145_v7  ;;  %627 = vst.sshfl [vmem:[#allocation2] sm:$0xf pattern:$0x76325410] %v145_v7 }
  0x13   : > { %215 = vrot.lane.b32.xlu1 %v207_v8, %s702_s15  ;;  %185 = vrot.lane.b32.xlu0 %v207_v8, %s703_s16  ;;  %v175_v12 = vrot.slane %v168_v9, %v174_v5  ;;  %v214_v13 = vrot.slane %v200_v11, %v174_v5 }
  0x14   : > { %628 = vst.sshfl [vmem:[#allocation2 + $0x8] sm:$0x3 pattern:$0x76325410] %v147_v10 }
  0x17   : > { %248 = vrot.lane.b32.xlu1 %v207_v8, %s704_s17  ;;  %183 = vrot.lane.b32.xlu0 %v175_v12, %s703_s16 }
  0x1b   : > { %217 = vrot.lane.b32.xlu1 %v214_v13, %s702_s15  ;;  %246 = vrot.lane.b32.xlu0 %v175_v12, %s704_s17 }
  0x1f   : > { %279 = vrot.lane.b32.xlu1 %v214_v13, %s706_s18  ;;  %277 = vrot.lane.b32.xlu0 %v207_v8, %s706_s18 }
  0x23   : > { %310 = vrot.lane.b32.xlu1 %v207_v8, %s707_s19  ;;  %308 = vrot.lane.b32.xlu0 %v175_v12, %s707_s19 }
  0x27   : > { %341 = vrot.lane.b32.xlu1 %v214_v13, %s708_s20  ;;  %339 = vrot.lane.b32.xlu0 %v207_v8, %s708_s20 }
  0x2b   : > { %372 = vrot.lane.b32.xlu1 %v207_v8, %s709_s21  ;;  %370 = vrot.lane.b32.xlu0 %v175_v12, %s709_s21 }
  0x2f   : > { %403 = vrot.lane.b32.xlu1 %v214_v13, %s710_s22  ;;  %401 = vrot.lane.b32.xlu0 %v207_v8, %s710_s22 }
  0x85   : > { %v216_v16 = vpop.permute.xlu1 %215  ;;  %v186_v17 = vpop.permute.xlu0 %185 }
  0x86   : > { %v188_v18 = vrot.slane %v186_v17, 4  ;;  %v219_v29 = vrot.slane %v216_v16, 4 }
  0x88   : > { %v193_v19 = vsel %vm191_vm1, %v186_v17, %v188_v18 }
  0x89   : > { %197 = vst [vmem:[#allocation2 + $0x8] sm:$0xc] %v193_v19  ;;  %v249_v20 = vpop.permute.xlu1 %248  ;;  %v184_v21 = vpop.permute.xlu0 %183 }
  0x8a   : > { %v251_v22 = vrot.slane %v249_v20, 4  ;;  %v187_v23 = vrot.slane %v184_v21, 4 }
  0x8c   : > { %v255_v24 = vsel %vm253_vm2, %v249_v20, %v251_v22  ;;  %v190_v25 = vsel %vm189_vm3, %v187_v23, %v188_v18  ;;  %v415_v20 = vld [vmem:[%s767_s1] sm:$0xf] }
  0x8d   : > { %259 = vst [vmem:[#allocation2 + $0x14] sm:$0xc] %v255_v24  ;;  %v192_v26 = vsel %vm191_vm1, %v184_v21, %v190_v25  ;;  %v218_v27 = vpop.permute.xlu1 %217  ;;  %v247_v28 = vpop.permute.xlu0 %246 }
  0x8e   : > { %196 = vst [vmem:[#allocation2] sm:$0xcc] %v192_v26  ;;  %v220_v30 = vrot.slane %v218_v27, 4  ;;  %v250_v31 = vrot.slane %v247_v28, 4 }
  0x90   : > { %v221_v32 = vsel %vm189_vm3, %v219_v29, %v220_v30  ;;  %v224_v33 = vsel %vm222_vm4, %v218_v27, %v220_v30  ;;  %v252_v34 = vsel %vm189_vm3, %v250_v31, %v251_v22 }
  0x91   : > { %v223_v35 = vsel %vm222_vm4, %v216_v16, %v221_v32  ;;  %228 = vst [vmem:[#allocation2 + $0x14] sm:$0x3] %v224_v33  ;;  %v254_v36 = vsel %vm253_vm2, %v247_v28, %v252_v34  ;;  %v280_v37 = vpop.permute.xlu1 %279  ;;  %v278_v38 = vpop.permute.xlu0 %277 }
  0x92   : > { %227 = vst [vmem:[#allocation2 + $0xc] sm:$0x33] %v223_v35  ;;  %258 = vst [vmem:[#allocation2 + $0xc] sm:$0xcc] %v254_v36  ;;  %v282_v39 = vrot.slane %v280_v37, 4  ;;  %v281_v40 = vrot.slane %v278_v38, 4 }
  0x94   : > { %v286_v41 = vsel %vm284_vm5, %v280_v37, %v282_v39  ;;  %v283_v42 = vsel %vm189_vm3, %v281_v40, %v282_v39 }
  0x95   : > { %290 = vst [vmem:[#allocation2 + $0x20] sm:$0x3] %v286_v41  ;;  %v285_v43 = vsel %vm284_vm5, %v278_v38, %v283_v42  ;;  %v311_v44 = vpop.permute.xlu1 %310  ;;  %v309_v45 = vpop.permute.xlu0 %308 }
  0x96   : > { %289 = vst [vmem:[#allocation2 + $0x18] sm:$0x33] %v285_v43  ;;  %v313_v46 = vrot.slane %v311_v44, 4  ;;  %v312_v47 = vrot.slane %v309_v45, 4 }
  0x98   : > { %v317_v48 = vsel %vm315_vm6, %v311_v44, %v313_v46  ;;  %v314_v49 = vsel %vm189_vm3, %v312_v47, %v313_v46  ;;  %v682_v50 = vld [vmem:[#allocation2 + $0x8] ss:$12 sps:$4 sm:$0xff]  }
  0x99   : > { %321 = vst [vmem:[#allocation2 + $0x20] sm:$0xc] %v317_v48  ;;  %v316_v51 = vsel %vm315_vm6, %v309_v45, %v314_v49  ;;  %v342_v52 = vpop.permute.xlu1 %341  ;;  %v340_v53 = vpop.permute.xlu0 %339  ;;  %v683_v54 = vld [vmem:[#allocation2 + $0x4] ss:$12 sps:$4 sm:$0xff]   ;;  %v685_v55 = vld [vmem:[#allocation2] ss:$12 sps:$4 sm:$0xff]   ;;  %649 = vmatpush3.bf16.msra.mxu1 %v682_v50 }
  0x9a   : > { %320 = vst [vmem:[#allocation2 + $0x18] sm:$0xcc] %v316_v51  ;;  %v344_v56 = vrot.slane %v342_v52, 4  ;;  %v343_v57 = vrot.slane %v340_v53, 4  ;;  %480 = vmatprep.subr.bf16.mxu0 %v683_v54  ;;  %650 = vmatprep.subr.bf16.mxu1 %v705_v14 }
  0x9b   : > { %481 = vmatpush1.bf16.msra.mxu0 %v685_v55 }
  0x9c   : > { %v348_v58 = vsel %vm346_vm7, %v342_v52, %v344_v56  ;;  %v345_v59 = vsel %vm189_vm3, %v343_v57, %v344_v56 }
  0x9d   : > { %352 = vst [vmem:[#allocation2 + $0x2c] sm:$0x3] %v348_v58  ;;  %v347_v60 = vsel %vm346_vm7, %v340_v53, %v345_v59  ;;  %v373_v61 = vpop.permute.xlu1 %372  ;;  %v371_v62 = vpop.permute.xlu0 %370 }
  0x9e   : > { %351 = vst [vmem:[#allocation2 + $0x24] sm:$0x33] %v347_v60  ;;  %v375_v63 = vrot.slane %v373_v61, 4  ;;  %v374_v0 = vrot.slane %v371_v62, 4 }
  0xa0   : > { %v379_v1 = vsel %vm377_vm8, %v373_v61, %v375_v63  ;;  %v376_v2 = vsel %vm189_vm3, %v374_v0, %v375_v63 }
  0xa1   : > { %383 = vst [vmem:[#allocation2 + $0x2c] sm:$0xc] %v379_v1  ;;  %v378_v3 = vsel %vm377_vm8, %v371_v62, %v376_v2  ;;  %v404_v4 = vpop.permute.xlu1 %403  ;;  %v402_v5 = vpop.permute.xlu0 %401 }
  0xa2   : > { %382 = vst [vmem:[#allocation2 + $0x24] sm:$0xcc] %v378_v3  ;;  %v406_v6 = vrot.slane %v404_v4, 4  ;;  %v405_v7 = vrot.slane %v402_v5, 4 }
  0xa4   : > { %v410_v8 = vsel %vm408_vm9, %v404_v4, %v406_v6  ;;  %v407_v9 = vsel %vm189_vm3, %v405_v7, %v406_v6 }
  0xa5   : > { %414 = vst [vmem:[#allocation2 + $0x38] sm:$0x3] %v410_v8  ;;  %v409_v10 = vsel %vm408_vm9, %v402_v5, %v407_v9 }
  0xa6   : > { %413 = vst [vmem:[#allocation2 + $0x30] sm:$0x33] %v409_v10 }
  0xa8   : > { %v686_v11 = vld [vmem:[#allocation2 + $0x20] ss:$12 sps:$4 sm:$0xff]  }
  0xa9   : > { %v687_v12 = vld [vmem:[#allocation2 + $0x1c] ss:$12 sps:$4 sm:$0xff]   ;;  %v689_v13 = vld [vmem:[#allocation2 + $0x18] ss:$12 sps:$4 sm:$0xff]   ;;  %651 = vmatpush3.bf16.msra.mxu1 %v686_v11 }
  0xaa   : > { %482 = vmatprep.subr.bf16.mxu0 %v687_v12  ;;  %652 = vmatprep.subr.bf16.mxu1 %v705_v14 }
  0xab   : > { %483 = vmatpush1.bf16.msra.mxu0 %v689_v13 }
  0xac   : > { %v691_v15 = vld [vmem:[#allocation2 + $0x38] ss:$0 sps:$4 sm:$0x33]  }
  0xad   : > { %v424_v16 = vld [vmem:[#allocation2 + $0x30] sm:$0x33]  ;;  %v478_v18 = vsel %vm470_vm10, %v691_v15, 0 }
  0xae   : > { %v636_v17 = vcombine.high %v424_v16, %v424_v16  ;;  %v635_v19 = vcombine.low %v424_v16, %v424_v16  ;;  %653 = vmatpush3.bf16.msra.mxu1 %v478_v18 }
  0xb0   : > { %638 = vmatprep.subr.msk.bf16.mxu0 %vm470_vm10, %v636_v17  ;;  %v472_v21 = vsel %vm470_vm10, %v635_v19, 0 }
  0xb1   : > { %485 = vmatpush1.bf16.msra.mxu0 %v472_v21  ;;  %655 = vmatmul.mubr.msk.bf16.vlgmr.msra.gmra.mrb[0].mxu1 %vm466_vm11, %v415_v20 }
  0xb4   : > { %639 = vmatmul.mubr.msk.bf16.vlgmr.msra.gmra.mrb[0].mxu0 %vm466_vm11, %v415_v20 }
 0x184   : > { %v555_v14 = vpop.f32.mrb[0].mxu1 }
 0x185   : > { %563 = vst [vmem:[%s143_s28 + $0x10] sm:$0xff] %v555_v14  ;;  %v656_v22 = vpop.f32.mrb[1].mxu1 }
 0x186   : > { %v558_v24 = vpop.f32.mrb[2].mxu1 }
 0x187   : > { %v514_v23 = vpop.f32.mrb[0].mxu0  ;;  %v657_v26 = vpop.f32.mrb[3].mxu1 }
 0x188   : > { %561 = vst [vmem:[%s143_s28] sm:$0xff] %v514_v23  ;;  %v516_v25 = vpop.f32.mrb[1].mxu0 }
 0x189   : > { %562 = vst [vmem:[%s143_s28 + $0x8] sm:$0xff] %v516_v25  ;;  %v518_v27 = vpop.f32.mrb[2].mxu0 }
 0x18a   : > { %v519_v28 = vpop.f32.mrb[3].mxu0 }
 0x18b PF: > { %s12_s9 = sadd.s32 1, %s699_s9  }
 0x18c   : > { %p9_p4 = scmp.ge.s32.totalorder %s12_s9, 4  }
 0x18e   :  { %11 = sbr.rel (!%p9_p4) target bundleno = 1 (0x1), region = 58 }

</bundles_post_ra>
